<compile_context>
chip_gen: v6e
topology: v6e:2x2x1
jax: 0.10.0
libtpu: 0.0.40
codegen_flags: <defaults>
</compile_context>

<pallas_src>
import functools

import jax
import jax.numpy as jnp
from jax.experimental import pallas as pl
from jax.experimental.pallas import tpu as pltpu

_LN_EPS = 1e-5


def _round_up(n, m):
    return ((n + m - 1) // m) * m


def _encoder_kernel(x_ref, w_in_ref, w1_ref, w2_ref, w_out_ref, vec_ref, o_ref,
                    *, hidden_dim, hidden_pad, latent_pad, compute_dtype):
    # x tile: (tile_b, obs_dim) f32; weights pre-transposed to (in, out).
    x = x_ref[...]

    vec = vec_ref[...].astype(jnp.float32)                  # (8, vec_pad)
    # Slices are at lane (128) boundaries -> layout-friendly.
    b_in = vec[0:1, :hidden_pad]
    b1, g1, be1 = vec[1:2, :hidden_pad], vec[2:3, :hidden_pad], vec[3:4, :hidden_pad]
    b2, g2, be2 = vec[4:5, :hidden_pad], vec[5:6, :hidden_pad], vec[6:7, :hidden_pad]
    b_out = vec[7:8, :latent_pad]

    inv_d = 1.0 / float(hidden_dim)                         # true (unpadded) dim

    # input_fc + ReLU
    h = jnp.dot(x.astype(compute_dtype), w_in_ref[...],
                preferred_element_type=jnp.float32)
    h = jnp.maximum(h + b_in, 0.0)

    def hidden_block(h, w_ref, b, g, be):
        z = jnp.dot(h.astype(compute_dtype), w_ref[...],
                    preferred_element_type=jnp.float32) + b
        # Fused LayerNorm stats: one pass for sum and sum-of-squares.
        # Padded lanes of z are exactly zero, so sums over the padded axis are
        # correct; divide by the true hidden_dim.
        s1 = jnp.sum(z, axis=-1, keepdims=True)
        s2 = jnp.sum(z * z, axis=-1, keepdims=True)
        mu = s1 * inv_d
        var = jnp.maximum(s2 * inv_d - mu * mu, 0.0)
        zn = (z - mu) * jax.lax.rsqrt(var + _LN_EPS)
        # gamma/beta are zero in padded lanes -> padded lanes stay exactly 0.
        return jnp.maximum(zn * g + be, 0.0)

    h = hidden_block(h, w1_ref, b1, g1, be1)
    h = hidden_block(h, w2_ref, b2, g2, be2)

    # output_fc (no activation)
    out = jnp.dot(h.astype(compute_dtype), w_out_ref[...],
                  preferred_element_type=jnp.float32) + b_out
    o_ref[...] = out.astype(o_ref.dtype)


def encoder_forward(x, params, *, compute_dtype=jnp.bfloat16, batch_tile=512):
    """x: (batch, obs_dim) float32. params: PyTorch-layout weights (out, in)."""
    batch, obs_dim = x.shape
    hidden_dim = params["w1"].shape[0]
    latent_dim = params["w_out"].shape[0]

    hidden_pad = _round_up(hidden_dim, 128)
    latent_pad = _round_up(latent_dim, 128)
    vec_pad = max(hidden_pad, latent_pad)

    # Pre-transpose to contraction-major (in, out) and zero-pad to lane-dense N.
    def prep_w(w, in_pad, out_pad):
        wt = jnp.asarray(w, jnp.float32).T
        wt = jnp.pad(wt, ((0, in_pad - wt.shape[0]), (0, out_pad - wt.shape[1])))
        return wt.astype(compute_dtype)

    w_in_t = prep_w(params["w_in"], obs_dim, hidden_pad)        # (obs, Hp)
    w1_t = prep_w(params["w1"], hidden_pad, hidden_pad)         # (Hp, Hp)
    w2_t = prep_w(params["w2"], hidden_pad, hidden_pad)         # (Hp, Hp)
    w_out_t = prep_w(params["w_out"], hidden_pad, latent_pad)   # (Hp, Lp)

    # Pack the 8 per-layer vectors into one (8, vec_pad) f32 array.
    def row(v):
        v = jnp.asarray(v, jnp.float32).reshape(-1)
        return jnp.pad(v, (0, vec_pad - v.shape[0]))

    vecs = jnp.stack([
        row(params["b_in"]),
        row(params["b1"]), row(params["g1"]), row(params["be1"]),
        row(params["b2"]), row(params["g2"]), row(params["be2"]),
        row(params["b_out"]),
    ])

    # Batch grid: tile rows (multiple of 8), pad batch up, parallel axis.
    tile_b = _round_up(min(int(batch_tile), _round_up(batch, 8)), 8)
    batch_pad = _round_up(batch, tile_b)
    n_tiles = batch_pad // tile_b
    x_p = jnp.pad(jnp.asarray(x, jnp.float32), ((0, batch_pad - batch), (0, 0)))

    kernel = functools.partial(
        _encoder_kernel,
        hidden_dim=hidden_dim, hidden_pad=hidden_pad, latent_pad=latent_pad,
        compute_dtype=compute_dtype,
    )

    out_p = pl.pallas_call(
        kernel,
        out_shape=jax.ShapeDtypeStruct((batch_pad, latent_pad), jnp.float32),
        grid=(n_tiles,),
        in_specs=[
            pl.BlockSpec((tile_b, obs_dim), lambda i: (i, 0)),        # x: batch-tiled
            pl.BlockSpec((obs_dim, hidden_pad), lambda i: (0, 0)),    # weights resident
            pl.BlockSpec((hidden_pad, hidden_pad), lambda i: (0, 0)),
            pl.BlockSpec((hidden_pad, hidden_pad), lambda i: (0, 0)),
            pl.BlockSpec((hidden_pad, latent_pad), lambda i: (0, 0)),
            pl.BlockSpec((8, vec_pad), lambda i: (0, 0)),             # packed vectors
        ],
        out_specs=pl.BlockSpec((tile_b, latent_pad), lambda i: (i, 0)),
        compiler_params=pltpu.CompilerParams(
            dimension_semantics=("parallel",),
        ),
    )(x_p, w_in_t, w1_t, w2_t, w_out_t, vecs)

    return out_p[:batch, :latent_dim]


def init_encoder_params(key, obs_dim, hidden_dim, latent_dim):
    """Deterministic synthetic params matching MLPModel.__init__ shapes."""
    ks = jax.random.split(key, 12)
    ortho_relu = jax.nn.initializers.orthogonal(scale=jnp.sqrt(2.0))  # gain('relu')
    ortho_lin = jax.nn.initializers.orthogonal(scale=1.0)

    w_in = ortho_lin(ks[0], (hidden_dim, obs_dim), jnp.float32)
    w1 = ortho_relu(ks[1], (hidden_dim, hidden_dim), jnp.float32)
    w2 = ortho_relu(ks[2], (hidden_dim, hidden_dim), jnp.float32)
    w_out = ortho_lin(ks[3], (latent_dim, hidden_dim), jnp.float32)

    # Non-zero biases / LN affine params so all kernel paths are exercised.
    b_in = 0.1 * jax.random.normal(ks[4], (hidden_dim,), jnp.float32)
    b1 = 0.1 * jax.random.normal(ks[5], (hidden_dim,), jnp.float32)
    b2 = 0.1 * jax.random.normal(ks[6], (hidden_dim,), jnp.float32)
    b_out = 0.1 * jax.random.normal(ks[7], (latent_dim,), jnp.float32)
    g1 = 1.0 + 0.1 * jax.random.normal(ks[8], (hidden_dim,), jnp.float32)
    g2 = 1.0 + 0.1 * jax.random.normal(ks[9], (hidden_dim,), jnp.float32)
    be1 = 0.1 * jax.random.normal(ks[10], (hidden_dim,), jnp.float32)
    be2 = 0.1 * jax.random.normal(ks[11], (hidden_dim,), jnp.float32)

    return dict(
        w_in=w_in, b_in=b_in,
        w1=w1, b1=b1, g1=g1, be1=be1,
        w2=w2, b2=b2, g2=g2, be2=be2,
        w_out=w_out, b_out=b_out,
    )


def _reference_forward(x, p):
    """Pure-JAX reference of the same PyTorch forward (for correctness checks)."""
    hp = jax.lax.Precision.HIGHEST

    def mm(a, b):
        return jnp.dot(a, b, precision=hp)

    h = jnp.maximum(mm(x, p["w_in"].T) + p["b_in"], 0.0)
    for w, b, g, be in ((p["w1"], p["b1"], p["g1"], p["be1"]),
                        (p["w2"], p["b2"], p["g2"], p["be2"])):
        z = mm(h, w.T) + b
        mu = z.mean(-1, keepdims=True)
        var = ((z - mu) ** 2).mean(-1, keepdims=True)
        zn = (z - mu) / jnp.sqrt(var + _LN_EPS)
        h = jnp.maximum(zn * g + be, 0.0)
    return mm(h, p["w_out"].T) + p["b_out"]


if __name__ == "__main__":
    key = jax.random.PRNGKey(0)
    k_x, k_x2, k_p = jax.random.split(key, 3)

    batch, obs_dim, hidden_dim, latent_dim = 8, 16, 32, 8
    x = jax.random.normal(k_x, (batch, obs_dim), jnp.float32)
    params = init_encoder_params(k_p, obs_dim, hidden_dim, latent_dim)
    ref = _reference_forward(x, params)

    # Exact-ish path (f32 MXU inputs) — tight check against the JAX reference
    # (tolerance allows for MXU f32 multi-pass rounding differences).
    out_f32 = encoder_forward(x, params, compute_dtype=jnp.float32)
    jax.block_until_ready(out_f32)
    assert out_f32.shape == (batch, latent_dim)
    assert jnp.allclose(out_f32, ref, atol=5e-3, rtol=5e-3)

    # Fast path (bf16 MXU inputs, f32 accumulation / LayerNorm) — loose check.
    out_bf16 = encoder_forward(x, params, compute_dtype=jnp.bfloat16)
    jax.block_until_ready(out_bf16)
    assert out_bf16.shape == (batch, latent_dim)
    assert jnp.allclose(out_bf16, ref, atol=1e-1, rtol=1e-1)

    # Exercise the batch grid (multiple tiles + batch padding).
    x2 = jax.random.normal(k_x2, (20, obs_dim), jnp.float32)
    out2 = encoder_forward(x2, params, compute_dtype=jnp.float32, batch_tile=8)
    jax.block_until_ready(out2)
    assert out2.shape == (20, latent_dim)
    assert jnp.allclose(out2, _reference_forward(x2, params), atol=5e-3, rtol=5e-3)

    print("KERNEL_OK")
</pallas_src>

<mosaic_0001>
module attributes {stable_mosaic.version = 11 : i64} {
  func.func @_encoder_kernel(%arg0: i32, %arg1: memref<8x16xf32, #tpu.memory_space<vmem>>, %arg2: memref<16x128xf32, #tpu.memory_space<vmem>>, %arg3: memref<128x128xf32, #tpu.memory_space<vmem>>, %arg4: memref<128x128xf32, #tpu.memory_space<vmem>>, %arg5: memref<128x128xf32, #tpu.memory_space<vmem>>, %arg6: memref<8x128xf32, #tpu.memory_space<vmem>>, %arg7: memref<8x128xf32, #tpu.memory_space<vmem>>) attributes {dimension_semantics = [#tpu.dimension_semantics<parallel>], iteration_bounds = array<i64: 1>, scalar_prefetch = 0 : i64, scratch_operands = 0 : i64, tpu.core_type = #tpu.core_type<tc>, window_params = [{transform_indices = @transform_0, window_bounds = array<i64: 8, 16>}, {pipeline_mode = #tpu.pipeline_mode<synchronous>, transform_indices = @transform_1, window_bounds = array<i64: 16, 128>}, {pipeline_mode = #tpu.pipeline_mode<synchronous>, transform_indices = @transform_2, window_bounds = array<i64: 128, 128>}, {pipeline_mode = #tpu.pipeline_mode<synchronous>, transform_indices = @transform_3, window_bounds = array<i64: 128, 128>}, {pipeline_mode = #tpu.pipeline_mode<synchronous>, transform_indices = @transform_4, window_bounds = array<i64: 128, 128>}, {pipeline_mode = #tpu.pipeline_mode<synchronous>, transform_indices = @transform_5, window_bounds = array<i64: 8, 128>}, {transform_indices = @transform_6, window_bounds = array<i64: 8, 128>}]} {
    %c0 = arith.constant 0 : index
    %c0_0 = arith.constant 0 : index
    %0 = vector.load %arg1[%c0, %c0_0] : memref<8x16xf32, #tpu.memory_space<vmem>>, vector<8x16xf32>
    %c0_1 = arith.constant 0 : index
    %c0_2 = arith.constant 0 : index
    %1 = vector.load %arg6[%c0_1, %c0_2] : memref<8x128xf32, #tpu.memory_space<vmem>>, vector<8x128xf32>
    %2 = vector.extract_strided_slice %1 {offsets = [0, 0], sizes = [1, 128], strides = [1, 1]} : vector<8x128xf32> to vector<1x128xf32>
    %3 = vector.extract_strided_slice %1 {offsets = [1, 0], sizes = [1, 128], strides = [1, 1]} : vector<8x128xf32> to vector<1x128xf32>
    %4 = vector.extract_strided_slice %1 {offsets = [2, 0], sizes = [1, 128], strides = [1, 1]} : vector<8x128xf32> to vector<1x128xf32>
    %5 = vector.extract_strided_slice %1 {offsets = [3, 0], sizes = [1, 128], strides = [1, 1]} : vector<8x128xf32> to vector<1x128xf32>
    %6 = vector.extract_strided_slice %1 {offsets = [4, 0], sizes = [1, 128], strides = [1, 1]} : vector<8x128xf32> to vector<1x128xf32>
    %7 = vector.extract_strided_slice %1 {offsets = [5, 0], sizes = [1, 128], strides = [1, 1]} : vector<8x128xf32> to vector<1x128xf32>
    %8 = vector.extract_strided_slice %1 {offsets = [6, 0], sizes = [1, 128], strides = [1, 1]} : vector<8x128xf32> to vector<1x128xf32>
    %9 = vector.extract_strided_slice %1 {offsets = [7, 0], sizes = [1, 128], strides = [1, 1]} : vector<8x128xf32> to vector<1x128xf32>
    %c0_3 = arith.constant 0 : index
    %c0_4 = arith.constant 0 : index
    %10 = vector.load %arg2[%c0_3, %c0_4] : memref<16x128xf32, #tpu.memory_space<vmem>>, vector<16x128xf32>
    %cst = arith.constant dense<0.000000e+00> : vector<8x128xf32>
    %11 = tpu.matmul %0, %10, %cst {dimension_numbers = #tpu.dot_dimension_numbers<[1], [0], [0], [1], [0, 0, 1, 1], [], []>} : vector<8x16xf32>, vector<16x128xf32>, vector<8x128xf32> -> vector<8x128xf32>
    %12 = vector.broadcast %2 : vector<1x128xf32> to vector<8x128xf32>
    %13 = arith.addf %11, %12 : vector<8x128xf32>
    %cst_5 = arith.constant 0.000000e+00 : f32
    %14 = vector.broadcast %cst_5 : f32 to vector<8x128xf32>
    %15 = arith.maximumf %13, %14 : vector<8x128xf32>
    %c0_6 = arith.constant 0 : index
    %c0_7 = arith.constant 0 : index
    %16 = vector.load %arg3[%c0_6, %c0_7] : memref<128x128xf32, #tpu.memory_space<vmem>>, vector<128x128xf32>
    %cst_8 = arith.constant dense<0.000000e+00> : vector<8x128xf32>
    %17 = tpu.matmul %15, %16, %cst_8 {dimension_numbers = #tpu.dot_dimension_numbers<[1], [0], [0], [1], [0, 0, 1, 1], [], []>} : vector<8x128xf32>, vector<128x128xf32>, vector<8x128xf32> -> vector<8x128xf32>
    %18 = vector.broadcast %3 : vector<1x128xf32> to vector<8x128xf32>
    %19 = arith.addf %17, %18 : vector<8x128xf32>
    %cst_9 = arith.constant dense<0.000000e+00> : vector<8xf32>
    %20 = vector.multi_reduction <add>, %19, %cst_9 [1] : vector<8x128xf32> to vector<8xf32>
    %21 = vector.shape_cast %20 : vector<8xf32> to vector<8x1xf32>
    %22 = arith.mulf %19, %19 : vector<8x128xf32>
    %cst_10 = arith.constant dense<0.000000e+00> : vector<8xf32>
    %23 = vector.multi_reduction <add>, %22, %cst_10 [1] : vector<8x128xf32> to vector<8xf32>
    %24 = vector.shape_cast %23 : vector<8xf32> to vector<8x1xf32>
    %cst_11 = arith.constant 3.125000e-02 : f32
    %25 = vector.broadcast %cst_11 : f32 to vector<8x1xf32>
    %26 = arith.mulf %21, %25 : vector<8x1xf32>
    %cst_12 = arith.constant 3.125000e-02 : f32
    %27 = vector.broadcast %cst_12 : f32 to vector<8x1xf32>
    %28 = arith.mulf %24, %27 : vector<8x1xf32>
    %29 = arith.mulf %26, %26 : vector<8x1xf32>
    %30 = arith.subf %28, %29 : vector<8x1xf32>
    %cst_13 = arith.constant 0.000000e+00 : f32
    %31 = vector.broadcast %cst_13 : f32 to vector<8x1xf32>
    %32 = arith.maximumf %30, %31 : vector<8x1xf32>
    %33 = vector.broadcast %26 : vector<8x1xf32> to vector<8x128xf32>
    %34 = arith.subf %19, %33 : vector<8x128xf32>
    %cst_14 = arith.constant 9.99999974E-6 : f32
    %35 = vector.broadcast %cst_14 : f32 to vector<8x1xf32>
    %36 = arith.addf %32, %35 : vector<8x1xf32>
    %37 = math.rsqrt %36 : vector<8x1xf32>
    %38 = vector.broadcast %37 : vector<8x1xf32> to vector<8x128xf32>
    %39 = arith.mulf %34, %38 : vector<8x128xf32>
    %40 = vector.broadcast %4 : vector<1x128xf32> to vector<8x128xf32>
    %41 = arith.mulf %39, %40 : vector<8x128xf32>
    %42 = vector.broadcast %5 : vector<1x128xf32> to vector<8x128xf32>
    %43 = arith.addf %41, %42 : vector<8x128xf32>
    %cst_15 = arith.constant 0.000000e+00 : f32
    %44 = vector.broadcast %cst_15 : f32 to vector<8x128xf32>
    %45 = arith.maximumf %43, %44 : vector<8x128xf32>
    %c0_16 = arith.constant 0 : index
    %c0_17 = arith.constant 0 : index
    %46 = vector.load %arg4[%c0_16, %c0_17] : memref<128x128xf32, #tpu.memory_space<vmem>>, vector<128x128xf32>
    %cst_18 = arith.constant dense<0.000000e+00> : vector<8x128xf32>
    %47 = tpu.matmul %45, %46, %cst_18 {dimension_numbers = #tpu.dot_dimension_numbers<[1], [0], [0], [1], [0, 0, 1, 1], [], []>} : vector<8x128xf32>, vector<128x128xf32>, vector<8x128xf32> -> vector<8x128xf32>
    %48 = vector.broadcast %6 : vector<1x128xf32> to vector<8x128xf32>
    %49 = arith.addf %47, %48 : vector<8x128xf32>
    %cst_19 = arith.constant dense<0.000000e+00> : vector<8xf32>
    %50 = vector.multi_reduction <add>, %49, %cst_19 [1] : vector<8x128xf32> to vector<8xf32>
    %51 = vector.shape_cast %50 : vector<8xf32> to vector<8x1xf32>
    %52 = arith.mulf %49, %49 : vector<8x128xf32>
    %cst_20 = arith.constant dense<0.000000e+00> : vector<8xf32>
    %53 = vector.multi_reduction <add>, %52, %cst_20 [1] : vector<8x128xf32> to vector<8xf32>
    %54 = vector.shape_cast %53 : vector<8xf32> to vector<8x1xf32>
    %cst_21 = arith.constant 3.125000e-02 : f32
    %55 = vector.broadcast %cst_21 : f32 to vector<8x1xf32>
    %56 = arith.mulf %51, %55 : vector<8x1xf32>
    %cst_22 = arith.constant 3.125000e-02 : f32
    %57 = vector.broadcast %cst_22 : f32 to vector<8x1xf32>
    %58 = arith.mulf %54, %57 : vector<8x1xf32>
    %59 = arith.mulf %56, %56 : vector<8x1xf32>
    %60 = arith.subf %58, %59 : vector<8x1xf32>
    %cst_23 = arith.constant 0.000000e+00 : f32
    %61 = vector.broadcast %cst_23 : f32 to vector<8x1xf32>
    %62 = arith.maximumf %60, %61 : vector<8x1xf32>
    %63 = vector.broadcast %56 : vector<8x1xf32> to vector<8x128xf32>
    %64 = arith.subf %49, %63 : vector<8x128xf32>
    %cst_24 = arith.constant 9.99999974E-6 : f32
    %65 = vector.broadcast %cst_24 : f32 to vector<8x1xf32>
    %66 = arith.addf %62, %65 : vector<8x1xf32>
    %67 = math.rsqrt %66 : vector<8x1xf32>
    %68 = vector.broadcast %67 : vector<8x1xf32> to vector<8x128xf32>
    %69 = arith.mulf %64, %68 : vector<8x128xf32>
    %70 = vector.broadcast %7 : vector<1x128xf32> to vector<8x128xf32>
    %71 = arith.mulf %69, %70 : vector<8x128xf32>
    %72 = vector.broadcast %8 : vector<1x128xf32> to vector<8x128xf32>
    %73 = arith.addf %71, %72 : vector<8x128xf32>
    %cst_25 = arith.constant 0.000000e+00 : f32
    %74 = vector.broadcast %cst_25 : f32 to vector<8x128xf32>
    %75 = arith.maximumf %73, %74 : vector<8x128xf32>
    %c0_26 = arith.constant 0 : index
    %c0_27 = arith.constant 0 : index
    %76 = vector.load %arg5[%c0_26, %c0_27] : memref<128x128xf32, #tpu.memory_space<vmem>>, vector<128x128xf32>
    %cst_28 = arith.constant dense<0.000000e+00> : vector<8x128xf32>
    %77 = tpu.matmul %75, %76, %cst_28 {dimension_numbers = #tpu.dot_dimension_numbers<[1], [0], [0], [1], [0, 0, 1, 1], [], []>} : vector<8x128xf32>, vector<128x128xf32>, vector<8x128xf32> -> vector<8x128xf32>
    %78 = vector.broadcast %9 : vector<1x128xf32> to vector<8x128xf32>
    %79 = arith.addf %77, %78 : vector<8x128xf32>
    %c0_29 = arith.constant 0 : index
    %c0_30 = arith.constant 0 : index
    %80 = vector.load %arg7[%c0_29, %c0_30] : memref<8x128xf32, #tpu.memory_space<vmem>>, vector<8x128xf32>
    tpu.vector_store %arg7[%c0_29, %c0_30], %79 {strides = array<i32>} : memref<8x128xf32, #tpu.memory_space<vmem>>, vector<8x128xf32>,
    return
  }
  func.func @transform_0(%arg0: i32) -> (i32, i32) {
    %c0_i32 = arith.constant 0 : i32
    %c0_i32_0 = arith.constant 0 : i32
    return %arg0, %c0_i32 : i32, i32
  }
  func.func @transform_1(%arg0: i32) -> (i32, i32) {
    %c0_i32 = arith.constant 0 : i32
    %c0_i32_0 = arith.constant 0 : i32
    %c0_i32_1 = arith.constant 0 : i32
    return %c0_i32, %c0_i32_0 : i32, i32
  }
  func.func @transform_2(%arg0: i32) -> (i32, i32) {
    %c0_i32 = arith.constant 0 : i32
    %c0_i32_0 = arith.constant 0 : i32
    %c0_i32_1 = arith.constant 0 : i32
    return %c0_i32, %c0_i32_0 : i32, i32
  }
  func.func @transform_3(%arg0: i32) -> (i32, i32) {
    %c0_i32 = arith.constant 0 : i32
    %c0_i32_0 = arith.constant 0 : i32
    %c0_i32_1 = arith.constant 0 : i32
    return %c0_i32, %c0_i32_0 : i32, i32
  }
  func.func @transform_4(%arg0: i32) -> (i32, i32) {
    %c0_i32 = arith.constant 0 : i32
    %c0_i32_0 = arith.constant 0 : i32
    %c0_i32_1 = arith.constant 0 : i32
    return %c0_i32, %c0_i32_0 : i32, i32
  }
  func.func @transform_5(%arg0: i32) -> (i32, i32) {
    %c0_i32 = arith.constant 0 : i32
    %c0_i32_0 = arith.constant 0 : i32
    %c0_i32_1 = arith.constant 0 : i32
    return %c0_i32, %c0_i32_0 : i32, i32
  }
  func.func @transform_6(%arg0: i32) -> (i32, i32) {
    %c0_i32 = arith.constant 0 : i32
    %c0_i32_0 = arith.constant 0 : i32
    return %arg0, %c0_i32 : i32, i32
  }
}

</mosaic_0001>

<bundles_post_ra>
// kernel: tpu_custom_call.1
= control target key start
LH: loop header
LB: loop body
LE: loop exit
PB: predicated region body
PF: predicated region fallthrough
CT: control target
= control target key end

     0   :  { %11 = vsyncpa [#allocation3], 0  ;;  %s988_s0 = inlined_call_operand.hbm [shape: f32[8,16], index: 0, kind: input, shape index: {}]   ;;  %s989_s1 = inlined_call_operand.hbm [shape: f32[16,128], index: 1, kind: input, shape index: {}]   ;;  %s990_s2 = inlined_call_operand.hbm [shape: f32[128,128], index: 2, kind: input, shape index: {}]   ;;  %s991_s3 = inlined_call_operand.hbm [shape: f32[128,128], index: 3, kind: input, shape index: {}]   ;;  %s992_s4 = inlined_call_operand.hbm [shape: f32[128,128], index: 4, kind: input, shape index: {}]   ;;  %s993_s5 = inlined_call_operand.vmem [shape: f32[8,128], index: 5, kind: input, shape index: {}]   ;;  %s994_s6 = inlined_call_operand.hbm [shape: f32[8,128], index: 6, kind: output, shape index: {}]  }
   0x1   :  { %12 = vsyncpa [#allocation6], 0 }
   0x2   :  { %13 = vsyncpa [#allocation9], 0 }
   0x3   :  { %14 = vsyncpa [#allocation4], 0  ;;  %s820_s21 = smov [#allocation5]  }
   0x4   :  { %s30_s22 = sshll.u32 %s820_s21, 4  ;;  %s31_s22 = int_to_ptr.vmem [resolvable:$true] %s30_s22 }
   0x5   :  { %s700_s23 = scalar_lea.vmem %s31_s22, 256  ;;  %p705_p1 = scmp.lt.s32.totalorder %s31_s22, %s31_s22 }
   0x6   :  { %p701_p0 = scmp.ne.s32.totalorder %s31_s22, %s700_s23  ;;  %p706_p2 = scmp.lt.s32.totalorder %s700_s23, %s700_s23 }
   0x8   :  { %p707_p3 = por %p706_p2, %p705_p1 }
   0xa   :  { %p708_p4 = pnand %p707_p3, %p701_p0 }
   0xc   :  { %711 = shalt.err (!%p708_p4)
}
   0xd   :  { %s821_s24 = smov 128   ;;  %s822_s25 = smov 8  }
   0xe   :  { %36 = dma.hbm_to_vmem [thread:$0]  %s989_s1, 256, %s31_s22, [#allocation6], %s821_s24, %s821_s24, %s822_s25  }
   0xf   :  { %s823_s28 = smov [#allocation8]   ;;  %s824_s30 = smov [#allocation2]  }
  0x10   :  { %s54_s29 = sshll.u32 %s823_s28, 4  ;;  %s21_s7 = sshll.u32 %s824_s30, 4  ;;  %s55_s29 = int_to_ptr.vmem [resolvable:$true] %s54_s29  ;;  %s22_s7 = int_to_ptr.vmem [resolvable:$true] %s21_s7 }
  0x11   :  { %s720_s8 = scalar_lea.vmem %s55_s29, 2048  ;;  %p725_p6 = scmp.lt.s32.totalorder %s55_s29, %s55_s29 }
  0x12   :  { %p721_p5 = scmp.ne.s32.totalorder %s55_s29, %s720_s8  ;;  %p726_p7 = scmp.lt.s32.totalorder %s720_s8, %s720_s8 }
  0x14   :  { %p727_p8 = por %p726_p7, %p725_p6 }
  0x16   :  { %p728_p9 = pnand %p727_p8, %p721_p5 }
  0x18   :  { %731 = shalt.err (!%p728_p9)
}
  0x19   :  { %60 = dma.hbm_to_vmem [thread:$0]  %s991_s3, 2048, %s55_s29, [#allocation9], %s821_s24, %s821_s24, %s822_s25  }
  0x1a   :  { %s740_s1 = scalar_lea.vmem %s22_s7, 128  ;;  %p745_p11 = scmp.lt.s32.totalorder %s22_s7, %s22_s7 }
  0x1b   :  { %p741_p10 = scmp.ne.s32.totalorder %s22_s7, %s740_s1  ;;  %p746_p12 = scmp.lt.s32.totalorder %s740_s1, %s740_s1 }
  0x1d   :  { %p747_p13 = por %p746_p12, %p745_p11 }
  0x1f   :  { %p748_p0 = pnand %p747_p13, %p741_p10 }
  0x21   :  { %751 = shalt.err (!%p748_p0)
}
  0x22   :  { %24 = dma.hbm_to_vmem [thread:$0]  %s988_s0, 128, %s22_s7, [#allocation3]  }
  0x23   :  { %s825_s13 = smov [#allocation7]   ;;  %s826_s15 = smov [#allocation10]  }
  0x24   :  { %s42_s14 = sshll.u32 %s825_s13, 4  ;;  %s66_s16 = sshll.u32 %s826_s15, 4  ;;  %s43_s14 = int_to_ptr.vmem [resolvable:$true] %s42_s14  ;;  %s67_s16 = int_to_ptr.vmem [resolvable:$true] %s66_s16 }
  0x25   :  { %s760_s17 = scalar_lea.vmem %s43_s14, 2048  ;;  %p765_p2 = scmp.lt.s32.totalorder %s43_s14, %s43_s14 }
  0x26   :  { %p761_p1 = scmp.ne.s32.totalorder %s43_s14, %s760_s17  ;;  %p766_p3 = scmp.lt.s32.totalorder %s760_s17, %s760_s17 }
  0x28   :  { %p767_p4 = por %p766_p3, %p765_p2 }
  0x2a   :  { %p768_p5 = pnand %p767_p4, %p761_p1 }
  0x2c   :  { %771 = shalt.err (!%p768_p5)
}
  0x2d   :  { %48 = dma.hbm_to_vmem [thread:$0]  %s990_s2, 2048, %s43_s14, [#allocation6], %s821_s24, %s821_s24, %s822_s25  }
  0x2e   :  { %s780_s0 = scalar_lea.vmem %s67_s16, 2048  ;;  %p785_p7 = scmp.lt.s32.totalorder %s67_s16, %s67_s16 }
  0x2f   :  { %p781_p6 = scmp.ne.s32.totalorder %s67_s16, %s780_s0  ;;  %p786_p8 = scmp.lt.s32.totalorder %s780_s0, %s780_s0 }
  0x31   :  { %p787_p9 = por %p786_p8, %p785_p7 }
  0x33   :  { %p788_p10 = pnand %p787_p9, %p781_p6 }
  0x35   :  { %791 = shalt.err (!%p788_p10)
}
  0x36   :  { %72 = dma.hbm_to_vmem [thread:$0]  %s992_s4, 2048, %s67_s16, [#allocation9], %s821_s24, %s821_s24, %s822_s25  }
  0x37   :  { %812 = dma.done.wait [#allocation3], 128  }
  0x38   :  { %813 = vsyncadd [#allocation3], 4294967168 }
  0x39   :  { %814 = dma.done.wait [#allocation6], 2304  }
  0x3a   :  { %815 = vsyncadd [#allocation6], 4294964992 }
  0x3b   :  { %816 = dma.done.wait [#allocation9], 4096  }
  0x3c   :  { %817 = vsyncadd [#allocation9], 4294963200  ;;  %v827_v0 = vmov 0.0   ;;  %vm828_vm0 = vmmov 0   ;;  %v93_v1 = vld [vmem:[#allocation5 + $0x8] sm:$0xff]  ;;  %v92_v2 = vld [vmem:[#allocation5] sm:$0xff]  ;;  %v94_v20 = vlaneseq }
  0x3d   :  { %566 = vmatprep.subr.mxu0 %v827_v0  ;;  %570 = vmatprep.mubr.msk.f32.mxu0 %vm828_vm0, %v827_v0  ;;  %v90_v3 = vld [vmem:[#allocation2] sm:$0xff]  ;;  %vm98_vm1 = vcmask 130048   ;;  %v188_v4 = vld [vmem:[#allocation7 + $0x78] sm:$0xff]  ;;  %v187_v5 = vld [vmem:[#allocation7 + $0x70] sm:$0xff] }
  0x3e   :  { %573 = vmatprep.subr.mxu1 %v827_v0  ;;  %605 = vmatprep.mubr.msk.f32.mxu1 %vm828_vm0, %v827_v0  ;;  %v186_v6 = vld [vmem:[#allocation7 + $0x68] sm:$0xff]  ;;  %v185_v7 = vld [vmem:[#allocation7 + $0x60] sm:$0xff]  ;;  %v184_v8 = vld [vmem:[#allocation7 + $0x58] sm:$0xff]  ;;  %v918_v21 = vshrl.u32 %v94_v20, 7 }
  0x3f   :  { %567 = vmatpush3.msra.mxu0 %v93_v1  ;;  %574 = vmatpush3.msra.mxu1 %v188_v4  ;;  %v183_v9 = vld [vmem:[#allocation7 + $0x50] sm:$0xff]  ;;  %v182_v10 = vld [vmem:[#allocation7 + $0x48] sm:$0xff]  ;;  %v181_v11 = vld [vmem:[#allocation7 + $0x40] sm:$0xff] }
  0x40   :  { %568 = vmatprep.subr.mxu0 %v827_v0  ;;  %575 = vmatprep.subr.mxu1 %v827_v0  ;;  %v180_v12 = vld [vmem:[#allocation7 + $0x38] sm:$0xff]  ;;  %v179_v13 = vld [vmem:[#allocation7 + $0x30] sm:$0xff]  ;;  %v178_v14 = vld [vmem:[#allocation7 + $0x28] sm:$0xff]  ;;  %v96_v22 = vsub.s32 0, %v918_v21  ;;  %v191_v29 = vsub.s32 1, %v918_v21  ;;  %v279_v59 = vsub.s32 2, %v918_v21 }
  0x41   :  { %569 = vmatpush3.msra.mxu0 %v92_v2  ;;  %576 = vmatpush3.msra.mxu1 %v187_v5  ;;  %v177_v15 = vld [vmem:[#allocation7 + $0x20] sm:$0xff]  ;;  %v176_v16 = vld [vmem:[#allocation7 + $0x18] sm:$0xff]  ;;  %v175_v17 = vld [vmem:[#allocation7 + $0x10] sm:$0xff]  ;;  %v284_v60 = vsub.s32 3, %v918_v21 }
  0x42   :  { %571 = vmatmul.mubr.msk.f32.vlgmr.msra.gmra.mxu0 %vm98_vm1, %v90_v3  ;;  %577 = vmatprep.subr.mxu1 %v827_v0  ;;  %v174_v18 = vld [vmem:[#allocation7 + $0x8] sm:$0xff]  ;;  %v173_v19 = vld [vmem:[#allocation7] sm:$0xff]  ;;  %v303_v35 = vld [vmem:[#allocation8 + $0x78] sm:$0xff] }
  0x43   :  { %608 = vmatprep.subr.mxu0 %v827_v0  ;;  %578 = vmatpush3.msra.mxu1 %v186_v6  ;;  %v924_v23 = vld [vmem:[%s993_s5] sm:$0xff]  ;;  %v302_v36 = vld [vmem:[#allocation8 + $0x70] sm:$0xff]  ;;  %v300_v38 = vld [vmem:[#allocation8 + $0x60] sm:$0xff]  ;;  %v306_v6 = vsub.s32 4, %v918_v21  ;;  %s829_s5 = smov [#allocation11]  }
  0x44   :  { %640 = vmatprep.mubr.msk.f32.mxu0 %vm828_vm0, %v827_v0  ;;  %579 = vmatprep.subr.mxu1 %v827_v0  ;;  %v97_v24 = vrot.slane %v924_v23, %v96_v22  ;;  %v192_v30 = vrot.slane %v924_v23, %v191_v29  ;;  %v301_v37 = vld [vmem:[#allocation8 + $0x68] sm:$0xff]  ;;  %v299_v39 = vld [vmem:[#allocation8 + $0x58] sm:$0xff]  ;;  %v298_v40 = vld [vmem:[#allocation8 + $0x50] sm:$0xff]  ;;  %v280_v62 = vrot.slane %v924_v23, %v279_v59  ;;  %s500_s21 = sshll.u32 %s829_s5, 4  ;;  %s501_s21 = int_to_ptr.vmem [resolvable:$true] %s500_s21 }
  0x45   :  { %580 = vmatpush3.msra.mxu1 %v185_v7  ;;  %609 = vmatpush3.msra.mxu0 %v303_v35  ;;  %v297_v41 = vld [vmem:[#allocation8 + $0x48] sm:$0xff]  ;;  %v296_v42 = vld [vmem:[#allocation8 + $0x40] sm:$0xff]  ;;  %v295_v43 = vld [vmem:[#allocation8 + $0x38] sm:$0xff]  ;;  %v285_v2 = vrot.slane %v924_v23, %v284_v60  ;;  %v307_v7 = vrot.slane %v924_v23, %v306_v6  ;;  %s792_s22 = scalar_lea.vmem %s501_s21, 128  ;;  %p797_p12 = scmp.lt.s32.totalorder %s501_s21, %s501_s21 }
  0x46   :  { %581 = vmatprep.subr.mxu1 %v827_v0  ;;  %610 = vmatprep.subr.mxu0 %v827_v0  ;;  %v294_v44 = vld [vmem:[#allocation8 + $0x30] sm:$0xff]  ;;  %v293_v45 = vld [vmem:[#allocation8 + $0x28] sm:$0xff]  ;;  %v292_v46 = vld [vmem:[#allocation8 + $0x20] sm:$0xff]  ;;  %p793_p11 = scmp.ne.s32.totalorder %s501_s21, %s792_s22  ;;  %p798_p13 = scmp.lt.s32.totalorder %s792_s22, %s792_s22 }
  0x47   :  { %582 = vmatpush3.msra.mxu1 %v184_v8  ;;  %611 = vmatpush3.msra.mxu0 %v302_v36  ;;  %v291_v47 = vld [vmem:[#allocation8 + $0x18] sm:$0xff]  ;;  %v290_v48 = vld [vmem:[#allocation8 + $0x10] sm:$0xff]  ;;  %v289_v49 = vld [vmem:[#allocation8 + $0x8] sm:$0xff] }
  0x48   :  { %583 = vmatprep.subr.mxu1 %v827_v0  ;;  %612 = vmatprep.subr.mxu0 %v827_v0  ;;  %v288_v50 = vld [vmem:[#allocation8] sm:$0xff]  ;;  %v410_v20 = vld [vmem:[#allocation10 + $0x38] sm:$0xff]  ;;  %v409_v22 = vld [vmem:[#allocation10 + $0x30] sm:$0xff]  ;;  %p799_p0 = por %p798_p13, %p797_p12 }
  0x49   :  { %584 = vmatpush3.msra.mxu1 %v183_v9  ;;  %613 = vmatpush3.msra.mxu0 %v301_v37  ;;  %v403_v29 = vld [vmem:[#allocation10] sm:$0xff] }
  0x4a   :  { %585 = vmatprep.subr.mxu1 %v827_v0  ;;  %614 = vmatprep.subr.mxu0 %v827_v0  ;;  %p800_p1 = pnand %p799_p0, %p793_p11 }
  0x4b   :  { %586 = vmatpush3.msra.mxu1 %v182_v10  ;;  %615 = vmatpush3.msra.mxu0 %v300_v38  ;;  %v394_v38 = vsub.s32 5, %v918_v21 }
  0x4c   :  { %587 = vmatprep.subr.mxu1 %v827_v0  ;;  %616 = vmatprep.subr.mxu0 %v827_v0 }
  0x4d   :  { %588 = vmatpush3.msra.mxu1 %v181_v11  ;;  %617 = vmatpush3.msra.mxu0 %v299_v39  ;;  %v399_v39 = vsub.s32 6, %v918_v21 }
  0x4e   :  { %589 = vmatprep.subr.mxu1 %v827_v0  ;;  %618 = vmatprep.subr.mxu0 %v827_v0 }
  0x4f   :  { %590 = vmatpush3.msra.mxu1 %v180_v12  ;;  %619 = vmatpush3.msra.mxu0 %v298_v40  ;;  %v418_v12 = vld [vmem:[#allocation10 + $0x78] sm:$0xff] }
  0x50   :  { %591 = vmatprep.subr.mxu1 %v827_v0  ;;  %620 = vmatprep.subr.mxu0 %v827_v0 }
  0x51   :  { %592 = vmatpush3.msra.mxu1 %v179_v13  ;;  %621 = vmatpush3.msra.mxu0 %v297_v41  ;;  %v417_v13 = vld [vmem:[#allocation10 + $0x70] sm:$0xff]  ;;  %v395_v41 = vrot.slane %v924_v23, %v394_v38 }
  0x52   :  { %593 = vmatprep.subr.mxu1 %v827_v0  ;;  %622 = vmatprep.subr.mxu0 %v827_v0 }
  0x53   :  { %594 = vmatpush3.msra.mxu1 %v178_v14  ;;  %623 = vmatpush3.msra.mxu0 %v296_v42  ;;  %v416_v14 = vld [vmem:[#allocation10 + $0x68] sm:$0xff] }
  0x54   :  { %595 = vmatprep.subr.mxu1 %v827_v0  ;;  %624 = vmatprep.subr.mxu0 %v827_v0 }
  0x55   :  { %596 = vmatpush3.msra.mxu1 %v177_v15  ;;  %625 = vmatpush3.msra.mxu0 %v295_v43  ;;  %v415_v15 = vld [vmem:[#allocation10 + $0x60] sm:$0xff]  ;;  %v400_v43 = vrot.slane %v924_v23, %v399_v39 }
  0x56   :  { %597 = vmatprep.subr.mxu1 %v827_v0  ;;  %626 = vmatprep.subr.mxu0 %v827_v0 }
  0x57   :  { %598 = vmatpush3.msra.mxu1 %v176_v16  ;;  %627 = vmatpush3.msra.mxu0 %v294_v44  ;;  %v414_v16 = vld [vmem:[#allocation10 + $0x58] sm:$0xff] }
  0x58   :  { %599 = vmatprep.subr.mxu1 %v827_v0  ;;  %628 = vmatprep.subr.mxu0 %v827_v0 }
  0x59   :  { %600 = vmatpush3.msra.mxu1 %v175_v17  ;;  %629 = vmatpush3.msra.mxu0 %v293_v45  ;;  %v413_v17 = vld [vmem:[#allocation10 + $0x50] sm:$0xff] }
  0x5a   :  { %601 = vmatprep.subr.mxu1 %v827_v0  ;;  %630 = vmatprep.subr.mxu0 %v827_v0 }
  0x5b   :  { %602 = vmatpush3.msra.mxu1 %v174_v18  ;;  %631 = vmatpush3.msra.mxu0 %v292_v46  ;;  %v412_v18 = vld [vmem:[#allocation10 + $0x48] sm:$0xff] }
  0x5c   :  { %603 = vmatprep.subr.mxu1 %v827_v0  ;;  %632 = vmatprep.subr.mxu0 %v827_v0 }
  0x5d   :  { %604 = vmatpush3.msra.mxu1 %v173_v19  ;;  %633 = vmatpush3.msra.mxu0 %v291_v47  ;;  %v411_v19 = vld [vmem:[#allocation10 + $0x40] sm:$0xff]  ;;  %v421_v47 = vsub.s32 7, %v918_v21 }
  0x5e   :  { %643 = vmatprep.subr.mxu1 %v827_v0  ;;  %634 = vmatprep.subr.mxu0 %v827_v0 }
  0x5f   :  { %635 = vmatpush3.msra.mxu0 %v290_v48  ;;  %v422_v48 = vrot.slane %v924_v23, %v421_v47 }
  0x60   :  { %636 = vmatprep.subr.mxu0 %v827_v0 }
  0x61   :  { %637 = vmatpush3.msra.mxu0 %v289_v49 }
  0x62   :  { %638 = vmatprep.subr.mxu0 %v827_v0 }
  0x63   :  { %639 = vmatpush3.msra.mxu0 %v288_v50 }
 0x102   :  { %v168_v25 = vpop.f32.mrf.mxu0 }
 0x103   :  { %v169_v26 = vadd.f32 %v168_v25, %v97_v24  ;;  %v408_v24 = vld [vmem:[#allocation10 + $0x28] sm:$0xff]  ;;  %v407_v25 = vld [vmem:[#allocation10 + $0x20] sm:$0xff] }
 0x104   :  { %v572_v27 = vpop.f32.mrf.mxu0 }
 0x105   :  { %v172_v28 = vmax.f32 %v169_v26, 0.0  ;;  %v406_v26 = vld [vmem:[#allocation10 + $0x18] sm:$0xff]  ;;  %v405_v27 = vld [vmem:[#allocation10 + $0x10] sm:$0xff] }
 0x107   :  { %606 = vmatmul.mubr.f32.vlgmr.msra.gmra.mxu1 %v172_v28  ;;  %v404_v28 = vld [vmem:[#allocation10 + $0x8] sm:$0xff] }
 0x108   :  { %675 = vmatprep.mubr.msk.f32.mxu1 %vm828_vm0, %v827_v0  ;;  %644 = vmatpush3.msra.mxu1 %v418_v12 }
 0x109   :  { %645 = vmatprep.subr.mxu1 %v827_v0 }
 0x10a   :  { %646 = vmatpush3.msra.mxu1 %v417_v13 }
 0x10b   :  { %647 = vmatprep.subr.mxu1 %v827_v0 }
 0x10c   :  { %648 = vmatpush3.msra.mxu1 %v416_v14 }
 0x10d   :  { %649 = vmatprep.subr.mxu1 %v827_v0 }
 0x10e   :  { %650 = vmatpush3.msra.mxu1 %v415_v15 }
 0x10f   :  { %651 = vmatprep.subr.mxu1 %v827_v0 }
 0x110   :  { %652 = vmatpush3.msra.mxu1 %v414_v16 }
 0x111   :  { %653 = vmatprep.subr.mxu1 %v827_v0 }
 0x112   :  { %654 = vmatpush3.msra.mxu1 %v413_v17 }
 0x113   :  { %655 = vmatprep.subr.mxu1 %v827_v0 }
 0x114   :  { %656 = vmatpush3.msra.mxu1 %v412_v18 }
 0x115   :  { %657 = vmatprep.subr.mxu1 %v827_v0 }
 0x116   :  { %658 = vmatpush3.msra.mxu1 %v411_v19 }
 0x117   :  { %659 = vmatprep.subr.mxu1 %v827_v0 }
 0x118   :  { %660 = vmatpush3.msra.mxu1 %v410_v20 }
 0x119   :  { %661 = vmatprep.subr.mxu1 %v827_v0 }
 0x11a   :  { %662 = vmatpush3.msra.mxu1 %v409_v22 }
 0x11b   :  { %663 = vmatprep.subr.mxu1 %v827_v0 }
 0x11c   :  { %664 = vmatpush3.msra.mxu1 %v408_v24 }
 0x11d   :  { %665 = vmatprep.subr.mxu1 %v827_v0 }
 0x11e   :  { %666 = vmatpush3.msra.mxu1 %v407_v25 }
 0x11f   :  { %667 = vmatprep.subr.mxu1 %v827_v0 }
 0x120   :  { %668 = vmatpush3.msra.mxu1 %v406_v26 }
 0x121   :  { %669 = vmatprep.subr.mxu1 %v827_v0 }
 0x122   :  { %670 = vmatpush3.msra.mxu1 %v405_v27 }
 0x123   :  { %671 = vmatprep.subr.mxu1 %v827_v0 }
 0x124   :  { %672 = vmatpush3.msra.mxu1 %v404_v28 }
 0x125   :  { %673 = vmatprep.subr.mxu1 %v827_v0 }
 0x126   :  { %674 = vmatpush3.msra.mxu1 %v403_v29 }
 0x1c7   :  { %v259_v31 = vpop.f32.mrf.mxu1 }
 0x1c8   :  { %v931_v32 = vadd.f32 %v259_v31, %v192_v30 }
 0x1c9   :  { %v607_v33 = vpop.f32.mrf.mxu1 }
 0x1ca   :  { %263 = vadd.xlane.f32.xlu0 %v931_v32  ;;  %v265_v34 = vmul.f32 %v931_v32, %v931_v32 }
 0x1ce   :  { %266 = vadd.xlane.f32.xlu0 %v265_v34 }
 0x253   :  { %v264_v51 = vpop.xlane.xlu0 %263 }
 0x254   :  { %v268_v52 = vmul.f32 0.03125, %v264_v51 }
 0x256   :  { %v270_v54 = vmul.f32 %v268_v52, %v268_v52  ;;  %v273_v61 = vsub.f32 %v931_v32, %v268_v52 }
 0x257   :  { %v267_v53 = vpop.xlane.xlu0 %266 }
 0x258   :  { %v269_v55 = vmul.f32 0.03125, %v267_v53 }
 0x25a   :  { %v271_v56 = vsub.f32 %v269_v55, %v270_v54 }
 0x25c   :  { %v272_v57 = vmax.f32 %v271_v56, 0.0 }
 0x25e   :  { %v274_v58 = vadd.f32 1e-05, %v272_v57 }
 0x260   :  { %688 = vrsqrt.f32 %v274_v58 }
 0x26d   :  { %v689_v63 = vpop.eup %688 }
 0x26e   :  { %v276_v1 = vmul.f32 %v689_v63, %v273_v61 }
 0x270   :  { %v281_v3 = vmul.f32 %v280_v62, %v276_v1 }
 0x272   :  { %v286_v4 = vadd.f32 %v285_v2, %v281_v3 }
 0x274   :  { %v287_v5 = vmax.f32 %v286_v4, 0.0 }
 0x276   :  { %641 = vmatmul.mubr.f32.vlgmr.msra.gmra.mxu0 %v287_v5 }
 0x336   :  { %v374_v8 = vpop.f32.mrf.mxu0 }
 0x337   :  { %v958_v9 = vadd.f32 %v374_v8, %v307_v7 }
 0x338   :  { %v642_v10 = vpop.f32.mrf.mxu0 }
 0x339   :  { %378 = vadd.xlane.f32.xlu1 %v958_v9  ;;  %v380_v11 = vmul.f32 %v958_v9, %v958_v9 }
 0x33d   :  { %381 = vadd.xlane.f32.xlu1 %v380_v11 }
 0x3c2   :  { %v379_v30 = vpop.xlane.xlu1 %378 }
 0x3c3   :  { %v383_v31 = vmul.f32 0.03125, %v379_v30 }
 0x3c5   :  { %v385_v33 = vmul.f32 %v383_v31, %v383_v31  ;;  %v388_v40 = vsub.f32 %v958_v9, %v383_v31 }
 0x3c6   :  { %v382_v32 = vpop.xlane.xlu1 %381 }
 0x3c7   :  { %v384_v34 = vmul.f32 0.03125, %v382_v32 }
 0x3c9   :  { %v386_v35 = vsub.f32 %v384_v34, %v385_v33 }
 0x3cb   :  { %v387_v36 = vmax.f32 %v386_v35, 0.0 }
 0x3cd   :  { %v389_v37 = vadd.f32 1e-05, %v387_v36 }
 0x3cf   :  { %690 = vrsqrt.f32 %v389_v37 }
 0x3dc   :  { %v691_v42 = vpop.eup %690 }
 0x3dd   :  { %v391_v0 = vmul.f32 %v691_v42, %v388_v40 }
 0x3df   :  { %v396_v44 = vmul.f32 %v395_v41, %v391_v0 }
 0x3e1   :  { %v401_v45 = vadd.f32 %v400_v43, %v396_v44 }
 0x3e3   :  { %v402_v46 = vmax.f32 %v401_v45, 0.0 }
 0x3e5   :  { %676 = vmatmul.mubr.f32.vlgmr.msra.gmra.mxu1 %v402_v46 }
 0x4a5   :  { %v489_v49 = vpop.f32.mrf.mxu1 }
 0x4a6   :  { %v490_v50 = vadd.f32 %v489_v49, %v422_v48 }
 0x4a7   :  { %v677_v51 = vpop.f32.mrf.mxu1 }
 0x4a8   :  { %493 = vst [vmem:[#allocation11] sm:$0xff] %v490_v50 }
 0x4a9   :  { %803 = shalt.err (!%p800_p1)
}
 0x4aa   :  { %503 = dma.vmem_to_hbm [thread:$0]  %s501_s21, 128, %s994_s6, [#allocation4]  }
 0x4ab   :  { %818 = dma.done.wait [#allocation4], 128  }
 0x4ac   :  { %819 = vsyncadd [#allocation4], 4294967168 }
 0x4ad   :  { %507 = vsyncpa [#allocation3], 1 }
 0x4ae   :  { %508 = vsyncpa [#allocation6], 1 }
 0x4af   :  { %509 = vsyncpa [#allocation9], 1 }
 0x4b0   :  { %510 = vsyncpa [#allocation4], 1 }

</bundles_post_ra>
